<compile_context>
chip_gen: v7x
topology: tpu7x:2x2x1
jax: 0.10.0
libtpu: 0.0.40
codegen_flags: <defaults>
</compile_context>

<pallas_src>
import jax
import jax.numpy as jnp
from jax.experimental import pallas as pl
from jax.experimental.pallas import tpu as pltpu


def _dropout_kernel(x_ref, s_ref, o_ref):
    # x_ref / o_ref: (br, bc) lane-dense tile in VMEM.
    # s_ref: (br, 1) per-row scaled keep-mask column -> broadcast multiply.
    o_ref[...] = x_ref[...] * s_ref[...]


_TARGET_TILE_BYTES = 8 * 1024 * 1024   # per-buffer target (~32 MiB double-buffered)
_VMEM_LIMIT_BYTES = 40 * 1024 * 1024   # fits v7x's 64 MiB per-TC VMEM with headroom


def _pick_tiles(rows, cols, itemsize):
    """Choose (br, bc) block sizes for the (rows, cols) lane-dense view."""
    row_base = 32 // itemsize          # sublane multiple: 8 f32, 16 bf16, 32 int8

    # Column tile: prefer full width (one contiguous HBM region per DMA).
    # A block dim equal to the full array dim is legal regardless of
    # 128-alignment; otherwise use a multiple of 128 and let the cdiv grid
    # handle the ragged last block (no degradation toward 128-wide tiles).
    max_cols = max(128, _TARGET_TILE_BYTES // (row_base * itemsize))
    if cols <= max_cols:
        bc = cols
    else:
        bc = (max_cols // 128) * 128

    # Row tile: fill the remaining per-buffer budget.
    br = min(rows, max(row_base, _TARGET_TILE_BYTES // (bc * itemsize)))
    if br < rows:
        br = max(row_base, (br // row_base) * row_base)

    # Megacore (v7x has 2 TCs): if everything collapsed into a single block,
    # split roughly in half along whichever axis can legally be split.
    if pl.cdiv(rows, br) * pl.cdiv(cols, bc) < 2:
        if rows > row_base:
            br = row_base * pl.cdiv(pl.cdiv(rows, 2), row_base)
        elif cols > 128:
            bc = 128 * pl.cdiv(pl.cdiv(cols, 2), 128)
    return br, bc


def dropout_layer_forward(x, p, key, training=True):
    """Forward pass of DropoutLayer.

    x: (N, C, H, W) array (f32 / bf16 / ...)
    p: drop probability (p < 1.0)
    key: jax PRNG key used to sample the per-channel Bernoulli mask

    Returns (out, scale) where scale is the per-channel scaled keep-mask
    (mask / (1 - p)); in eval mode out == x and scale is all-ones.
    """
    assert p < 1.0
    N, C, H, W = x.shape

    if not training:
        return x, jnp.ones((C,), dtype=x.dtype)

    keep = 1.0 - p
    # Per-channel Bernoulli(1 - p) mask scaled by 1/(1 - p), matching the
    # PyTorch module's self.mask / (1.0 - self.p).
    mask = jax.random.bernoulli(key, p=keep, shape=(C,)).astype(x.dtype)
    scale = mask / jnp.asarray(keep, dtype=x.dtype)

    rows, cols = N * C, H * W
    x2 = x.reshape(rows, cols)
    # Row r = n*C + c  ->  channel c = r % C, so tiling the (C,) scale N times
    # gives the per-row scale column (tiny: N*C elements).
    s2 = jnp.tile(scale, N).reshape(rows, 1)

    itemsize = jnp.dtype(x.dtype).itemsize
    br, bc = _pick_tiles(rows, cols, itemsize)

    out2 = pl.pallas_call(
        _dropout_kernel,
        out_shape=jax.ShapeDtypeStruct((rows, cols), x.dtype),
        grid_spec=pltpu.PrefetchScalarGridSpec(
            num_scalar_prefetch=0,
            # cdiv grid: ragged last blocks are edge-masked by Pallas, so no
            # HBM-level jnp.pad / slice round-trip is needed.
            grid=(pl.cdiv(rows, br), pl.cdiv(cols, bc)),
            in_specs=[
                pl.BlockSpec((br, bc), lambda i, j: (i, j)),
                # Independent of j (innermost grid axis) -> re-fetch elided.
                pl.BlockSpec((br, 1), lambda i, j: (i, 0)),
            ],
            out_specs=pl.BlockSpec((br, bc), lambda i, j: (i, j)),
        ),
        compiler_params=pltpu.CompilerParams(
            dimension_semantics=("parallel", "parallel"),
            vmem_limit_bytes=_VMEM_LIMIT_BYTES,
        ),
    )(x2, s2)

    return out2.reshape(N, C, H, W), scale


if __name__ == "__main__":
    key = jax.random.PRNGKey(0)
    k_x, k_mask, k_x2 = jax.random.split(key, 3)

    # Primary example (matches the module's typical NCHW input).
    N, C, H, W = 2, 4, 16, 16
    p = 0.5
    x = jax.random.normal(k_x, (N, C, H, W), dtype=jnp.float32)

    out, scale = dropout_layer_forward(x, p, k_mask, training=True)
    out = jax.block_until_ready(out)

    ref = x * scale[None, :, None, None]
    assert out.shape == x.shape
    assert out.dtype == x.dtype
    assert jnp.allclose(out, ref, atol=1e-6, rtol=1e-6)

    # Secondary check: row count not a multiple of the block -> exercises the
    # ragged (edge-masked) last block path with no HBM padding.
    xb = jax.random.normal(k_x2, (2, 5, 16, 16), dtype=jnp.float32)
    outb, scaleb = dropout_layer_forward(xb, 0.3, k_mask, training=True)
    outb = jax.block_until_ready(outb)
    refb = xb * scaleb[None, :, None, None]
    assert jnp.allclose(outb, refb, atol=1e-6, rtol=1e-6)

    # Eval mode: identity (consistent (out, scale) return structure).
    out_eval, _ = dropout_layer_forward(x, p, k_mask, training=False)
    assert jnp.array_equal(out_eval, x)

    print("KERNEL_OK")
</pallas_src>

<mosaic_0001>
module attributes {stable_mosaic.version = 11 : i64} {
  func.func @_dropout_kernel(%arg0: i32, %arg1: i32, %arg2: memref<8x128xf32, #tpu.memory_space<vmem>>, %arg3: memref<8x1xf32, #tpu.memory_space<vmem>>, %arg4: memref<8x128xf32, #tpu.memory_space<vmem>>) attributes {dimension_semantics = [#tpu.dimension_semantics<parallel>, #tpu.dimension_semantics<parallel>], iteration_bounds = array<i64: 1, 2>, scalar_prefetch = 0 : i64, scratch_operands = 0 : i64, tpu.core_type = #tpu.core_type<tc>, window_params = [{transform_indices = @transform_0, window_bounds = array<i64: 8, 128>}, {transform_indices = @transform_1, window_bounds = array<i64: 8, 1>}, {transform_indices = @transform_2, window_bounds = array<i64: 8, 128>}]} {
    %c0 = arith.constant 0 : index
    %c0_0 = arith.constant 0 : index
    %0 = vector.load %arg2[%c0, %c0_0] : memref<8x128xf32, #tpu.memory_space<vmem>>, vector<8x128xf32>
    %c0_1 = arith.constant 0 : index
    %c0_2 = arith.constant 0 : index
    %1 = vector.load %arg3[%c0_1, %c0_2] : memref<8x1xf32, #tpu.memory_space<vmem>>, vector<8x1xf32>
    %2 = vector.broadcast %1 : vector<8x1xf32> to vector<8x128xf32>
    %3 = arith.mulf %0, %2 : vector<8x128xf32>
    %c0_3 = arith.constant 0 : index
    %c0_4 = arith.constant 0 : index
    %4 = vector.load %arg4[%c0_3, %c0_4] : memref<8x128xf32, #tpu.memory_space<vmem>>, vector<8x128xf32>
    tpu.vector_store %arg4[%c0_3, %c0_4], %3 {strides = array<i32>} : memref<8x128xf32, #tpu.memory_space<vmem>>, vector<8x128xf32>,
    return
  }
  func.func @transform_0(%arg0: i32, %arg1: i32) -> (i32, i32) {
    %c0_i32 = arith.constant 0 : i32
    return %arg0, %arg1 : i32, i32
  }
  func.func @transform_1(%arg0: i32, %arg1: i32) -> (i32, i32) {
    %c0_i32 = arith.constant 0 : i32
    %c0_i32_0 = arith.constant 0 : i32
    return %arg0, %c0_i32 : i32, i32
  }
  func.func @transform_2(%arg0: i32, %arg1: i32) -> (i32, i32) {
    %c0_i32 = arith.constant 0 : i32
    return %arg0, %arg1 : i32, i32
  }
}

</mosaic_0001>

<bundles_post_ra>
// kernel: tpu_custom_call.1
= control target key start
LH: loop header
LB: loop body
LE: loop exit
PB: predicated region body
PF: predicated region fallthrough
CT: control target
= control target key end

     0   :  { %7 = vsyncpa [#allocation3], 0  ;;  %s701_s0 = inlined_call_operand.hbm [shape: f32[8,256], index: 0, kind: input, shape index: {}]   ;;  %s702_s1 = inlined_call_operand.vmem [shape: f32[8,1], index: 1, kind: input, shape index: {}]   ;;  %s703_s2 = inlined_call_operand.hbm [shape: f32[8,256], index: 2, kind: output, shape index: {}]  }
   0x1   :  { %9 = vsyncpa [#allocation3 + $0x1], 0 }
   0x2   :  { %10 = vsyncpa [#allocation4], 0 }
   0x3   :  { %12 = vsyncpa [#allocation4 + $0x1], 0  ;;  %s526_s9 = smov 0   ;;  %s528_s10 = smov 0  }
   0x4   :  { %s530_s11 = smov 0   ;;  %s532_s12 = smov 0  }
   0x5   :  { %s534_s13 = smov 0   ;;  %s536_s14 = smov 0  }
   0x6 LB: > { %s316_s15 = sadd.s32 4294967295, %s506_s14   ;;  %s317_s16 = sadd.s32 4294967294, %s506_s14   ;;  %s506_s14 = sphi %s536_s14, %s18_s14   ;;  %s502_s13 = sphi %s534_s13, %s719_s13   ;;  %s498_s12 = sphi %s532_s12, %s718_s12   ;;  %s494_s11 = sphi %s530_s11, %s717_s11   ;;  %s490_s10 = sphi %s528_s10, %s716_s10   ;;  %s486_s9 = sphi %s526_s9, %s715_s9  }
   0x7   : > { %s27_s17 = sadd.s32 1, %s502_s13  ;;  %s39_s18 = sadd.s32 1, %s494_s11 }
   0x8   : > { %p28_p0 = scmp.ge.s32.totalorder %s27_s17, 2  ;;  %p46_p1 = scmp.ne.s32.totalorder %s494_s11, %s490_s10 }
   0x9   : > { %p47_p2 = scmp.eq.s32.totalorder %s506_s14, 0  ;;  %p52_p3 = scmp.ne.s32.totalorder %s490_s10, %s486_s9 }
   0xa   : > { %s721_s17 = smov (%p28_p0, %s27_s17), 0  ;;  %p53_p5 = scmp.eq.s32.totalorder %s316_s15, 0 }
   0xb   : > { %p567_p4 = por %p47_p2, %p46_p1  ;;  %s35_s20 = ssub.s32 %s502_s13, %s721_s17 }
   0xc   : > { %p104_p6 = scmp.eq.s32.totalorder %s316_s15, 1  ;;  %p37_p7 = scmp.eq.s32.totalorder %s35_s20, 0 }
   0xd   : > { %p573_p8 = por %p53_p5, %p52_p3  ;;  %p110_p10 = scmp.eq.s32.totalorder %s317_s16, 1 }
   0xe   : > { %p577_p9 = por %p104_p6, %p46_p1  ;;  %p342_p13 = scmp.lt.s32.totalorder %s506_s14, 2 }
   0xf   : > { %s582_s23 = scalar_select %p37_p7, %s494_s11, %s39_s18  }
  0x10   : > { %s707_s22 = scalar_select %p577_p9, 1, 0 }
  0x11   : > { %p584_p11 = por %p110_p10, %p52_p3  ;;  %s137_s25 = sand.u32 1, %s494_s11  }
  0x12   : > { %s321_s26 = sshll.u32 %s137_s25, 3  ;;  %s322_s27 = sshll.u32 %s502_s13, 7 }
  0x13   : > { %s708_s24 = scalar_select %p584_p11, 1, 0 }
  0x14   : > { %s595_s30 = scalar_lea.hbm %s701_s0, %s322_s27  ;;  %s141_s3 = scalar_lea.vmem [#allocation2], %s321_s26 }
  0x15   : > { %s150_s4 = sshll.u32 %s141_s3, 4  ;;  %p601_p0 = pnand %p342_p13, %p567_p4  ;;  %s597_s4 = int_to_ptr.vmem [resolvable:$true] %s150_s4 }
  0x16   : > { %s138_s6 = scalar_lea.sflag [#allocation3], %s137_s25  ;;  %s394_s7 = scalar_lea.hbm %s595_s30, 128 }
  0x17   : > { %p395_p3 = scmp.ne.s32.totalorder %s595_s30, %s394_s7  ;;  %p396_p5 = pneg %p601_p0 }
  0x18   : > { %s399_s16 = scalar_lea.hbm %s701_s0, 256  ;;  %p400_p4 = scmp.lt.u32.totalorder %s595_s30, %s701_s0 }
  0x19   : > { %p397_p6 = pnand %p396_p5, %p395_p3  ;;  %p401_p10 = scmp.lt.u32.totalorder %s399_s16, %s394_s7 }
  0x1a   : > { %p403_p12 = scmp.lt.u32.totalorder %s394_s7, %s595_s30 }
  0x1b   : > { %p398_p7 = pneg %p397_p6  ;;  %p402_p13 = por %p401_p10, %p400_p4 }
  0x1d   : > { %p404_p1 = por %p403_p12, %p402_p13 }
  0x1f   : > { %p405_p2 = pnand %p404_p1, %p398_p7 }
  0x21   : > { %408 = shalt.err (!%p405_p2)
}
  0x22   : > { %s409_s20 = scalar_lea.vmem %s597_s4, 128  ;;  %s508_s25 = smov [#allocation2]  }
  0x23   : > { %p410_p3 = scmp.ne.s32.totalorder %s597_s4, %s409_s20  ;;  %s414_s26 = sshll.u32 %s508_s25, 4  ;;  %s415_s26 = int_to_ptr.vmem [resolvable:$false] %s414_s26 }
  0x24   : > { %s416_s27 = scalar_lea.vmem %s415_s26, 256  ;;  %p417_p9 = scmp.lt.s32.totalorder %s597_s4, %s415_s26 }
  0x25   : > { %p412_p6 = pnand %p410_p3, %p396_p5  ;;  %p418_p4 = scmp.lt.s32.totalorder %s416_s27, %s409_s20 }
  0x27   : > { %p413_p11 = pneg %p412_p6  ;;  %p419_p10 = por %p418_p4, %p417_p9 }
  0x29   : > { %p420_p12 = pnand %p419_p10, %p413_p11 }
  0x2b   : > { %423 = shalt.err (!%p420_p12)
}
  0x2c   : > { %337 = dma.hbm_to_vmem [thread:$0]  (!%p601_p0), %s595_s30, 128, %s597_s4, %s138_s6  }
  0x2d   : > { %p710_p1 = scmp.lt.s32.totalorder %s506_s14, 3  ;;  %p711_p2 = scmp.ge.s32.totalorder %s506_s14, 1 }
  0x2f   : > { %p156_p5 = pnand %p711_p2, %p710_p1 }
  0x30   : > { %s637_s28 = sand.u32 (!%p156_p5), 1, %s490_s10  }
  0x31   : > { %159 = sbr.rel (%p156_p5) target bundleno = 203 (0xcb), region = 28  ;;  %s324_s29 = sshll.u32 (!%p156_p5), %s637_s28, 3 }
  0x32   : > { %s162_s3 = scalar_lea.sflag (!%p156_p5), [#allocation3], %s637_s28  ;;  %s165_s7 = scalar_lea.vmem (!%p156_p5), [#allocation2], %s324_s29 }
  0x38   : > { %477 = dma.done.wait (%p573_p8), %s162_s3, 128  }
  0x39   : > { %479 = vsyncadd (%p573_p8), %s162_s3, 4294967168  ;;  %v509_v0 = vmov 0   ;;  %v195_v1 = vld [vmem:[%s702_s1] sm:$0xff]  ;;  %s327_s5 = sshll.u32 %s498_s12, 7  ;;  %s189_s6 = scalar_lea.vmem [#allocation5], %s324_s29 }
  0x3a   : > { %393 = vset.pattern.permute.xlu0 %v509_v0  ;;  %v194_v2 = vld [vmem:[%s165_s7] sm:$0xff]  ;;  %s219_s8 = sshll.u32 %s189_s6, 4  ;;  %s652_s21 = scalar_lea.hbm %s703_s2, %s327_s5  ;;  %s654_s8 = int_to_ptr.vmem [resolvable:$true] %s219_s8 }
  0x3b   : > { %198 = vperm.xlu0 %393, %v195_v1   ;;  %s204_s18 = scalar_lea.sflag [#allocation4], %s637_s28  ;;  %s424_s19 = scalar_lea.vmem %s654_s8, 128 }
  0x3c   : > { %p425_p8 = scmp.ne.s32.totalorder %s654_s8, %s424_s19  ;;  %p712_p9 = scmp.ne.s32.totalorder %s707_s22, 0 }
  0x3d   : > { %s510_s12 = smov [#allocation5]  }
  0x3e   : > { %p426_p11 = pnand %p425_p8, %p712_p9  ;;  %s428_s20 = sshll.u32 %s510_s12, 4  ;;  %s429_s20 = int_to_ptr.vmem [resolvable:$false] %s428_s20 }
  0x3f   : > { %s430_s25 = scalar_lea.vmem %s429_s20, 256  ;;  %p431_p7 = scmp.lt.s32.totalorder %s654_s8, %s429_s20 }
  0x40   : > { %p427_p0 = pneg %p426_p11  ;;  %p432_p13 = scmp.lt.s32.totalorder %s430_s25, %s424_s19 }
  0x42   : > { %p433_p3 = por %p432_p13, %p431_p7 }
  0x44   : > { %p434_p6 = pnand %p433_p3, %p427_p0 }
  0xba   : > { %v199_v3 = vpop.permute.xlu0 %198 }
  0xbb   : > { %v201_v4 = vmul.f32 %v199_v3, %v194_v2 }
  0xbd   : > { %202 = vst [vmem:[%s189_s6] sm:$0xff] %v201_v4 }
  0xbe   : > { %437 = shalt.err (!%p434_p6)
}
  0xbf   : > { %s438_s26 = scalar_lea.hbm %s652_s21, 128  ;;  %s442_s29 = scalar_lea.hbm %s703_s2, 256 }
  0xc0   : > { %p439_p4 = scmp.ne.s32.totalorder %s652_s21, %s438_s26  ;;  %p443_p1 = scmp.lt.u32.totalorder %s652_s21, %s703_s2 }
  0xc1   : > { %p444_p2 = scmp.lt.u32.totalorder %s442_s29, %s438_s26  ;;  %p446_p8 = scmp.lt.u32.totalorder %s438_s26, %s652_s21 }
  0xc2   : > { %p440_p10 = pnand %p439_p4, %p712_p9 }
  0xc3   : > { %p445_p5 = por %p444_p2, %p443_p1 }
  0xc4   : > { %p441_p12 = pneg %p440_p10 }
  0xc5   : > { %p447_p11 = por %p446_p8, %p445_p5 }
  0xc7   : > { %p448_p0 = pnand %p447_p11, %p441_p12 }
  0xc9   : > { %451 = shalt.err (!%p448_p0)
}
  0xca   : > { %332 = dma.vmem_to_hbm [thread:$0]  (%p712_p9), %s654_s8, 128, %s652_s21, %s204_s18  }
  0xcb PF: > { %s231_s30 = sand.u32 1, %s486_s9   ;;  %p713_p7 = scmp.ne.s32.totalorder %s708_s24, 0 }
  0xcc   : > { %p714_p13 = scmp.ge.s32.totalorder %s506_s14, 2  ;;  %s232_s4 = scalar_lea.sflag [#allocation4], %s231_s30 }
  0xce   : > { %p339_p3 = pnand %p714_p13, %p713_p7 }
  0xd0   : > { %481 = dma.done.wait (!%p339_p3), %s232_s4, 128  }
  0xd1   : > { %483 = vsyncadd (!%p339_p3), %s232_s4, 4294967168  ;;  %s18_s14 = sadd.s32 1, %s506_s14   ;;  %s715_s9 = smov %s490_s10 }
  0xd2   : > { %p15_p6 = scmp.ge.s32.totalorder %s18_s14, 4   ;;  %s716_s10 = smov %s494_s11 }
  0xd3   : > { %s717_s11 = smov %s582_s23  ;;  %s718_s12 = smov %s502_s13 }
  0xd4   : > { %s719_s13 = smov %s721_s17  ;;  %17 = sbr.rel (!%p15_p6) target bundleno = 6 (0x6), region = 76 }
  0xdb   :  { %237 = vsyncpa [#allocation3], 1 }
  0xdc   :  { %239 = vsyncpa [#allocation3 + $0x1], 1 }
  0xdd   :  { %240 = vsyncpa [#allocation4], 1 }
  0xde   :  { %242 = vsyncpa [#allocation4 + $0x1], 1 }

</bundles_post_ra>
